<compile_context>
chip_gen: v7x
topology: tpu7x:2x2x1
jax: 0.10.0
libtpu: 0.0.40
codegen_flags: <defaults>
</compile_context>

<pallas_src>
import jax
import jax.numpy as jnp
import numpy as np
from jax.experimental import pallas as pl
from jax.experimental.pallas import tpu as pltpu


def _noise_kernel(scale_ref, x_ref, noise_ref, o_ref):
    # scale_ref: (1,)  f32 scalar in SMEM (scalar prefetch)
    # x_ref:     (1, tc, thw)   activation tile
    # noise_ref: (1, 1, thw)    per-pixel noise (broadcast over channels)
    # o_ref:     (1, tc, thw)
    s = scale_ref[0]
    scaled_noise = noise_ref[...].astype(jnp.float32) * s      # f32 multiply
    o_ref[...] = (x_ref[...] + scaled_noise).astype(o_ref.dtype)


def _sublane_multiple(dtype):
    # 8 for f32, 16 for bf16, 32 for int8/fp8 (packed sublanes).
    return max(8, 32 // jnp.dtype(dtype).itemsize)


def _pick_tiles(C, HW, dtype, target_block_bytes=8 << 20):
    """Pick (tc, thw) block dims.

    tc: full channel extent when C <= 512 (always a legal block dim),
        otherwise 512 (multiple of every sublane packing factor).
    thw: multiple of 128 (lane-aligned) sized so the x block is ~target bytes,
         or the full spatial extent when it already fits.
    Non-divisible extents are handled by pl.cdiv grids (masked tail blocks).
    """
    itemsize = jnp.dtype(dtype).itemsize
    sub = _sublane_multiple(dtype)

    if C <= 512:
        tc = C                      # full extent: legal regardless of alignment
    else:
        tc = (512 // sub) * sub     # == 512 for all supported dtypes

    thw_cap = max(128, (target_block_bytes // (tc * itemsize)) // 128 * 128)
    thw = HW if HW <= thw_cap else thw_cap
    return tc, thw


def pixelwise_randomized_noise(x, noise, noise_scaler):
    """Pallas implementation of PixelwiseRondomizedNoise.forward.

    Args:
      x:            (N, C, H, W) activations.
      noise:        (N, 1, H, W) standard-normal noise (shared across channels).
      noise_scaler: scalar (the module's learned parameter).
    Returns:
      (N, C, H, W) = x + noise * noise_scaler
    """
    N, C, H, W = x.shape
    HW = H * W

    x2 = x.reshape(N, C, HW)
    noise2 = noise.reshape(N, 1, HW).astype(x.dtype)
    scale = jnp.asarray(noise_scaler, dtype=jnp.float32).reshape(1)

    tc, thw = _pick_tiles(C, HW, x.dtype)
    n_c = pl.cdiv(C, tc)
    n_s = pl.cdiv(HW, thw)

    # VMEM budget: double-buffered x block + out block + noise block (+ slack).
    itemsize = jnp.dtype(x.dtype).itemsize
    block_bytes = tc * thw * itemsize
    noise_bytes = thw * itemsize
    needed = 2 * (2 * block_bytes + noise_bytes) + (2 << 20)
    vmem_limit = int(min(max(needed, 16 << 20), 48 << 20))

    out = pl.pallas_call(
        _noise_kernel,
        out_shape=jax.ShapeDtypeStruct((N, C, HW), x.dtype),
        grid_spec=pltpu.PrefetchScalarGridSpec(
            num_scalar_prefetch=1,                     # noise_scaler -> SMEM
            # Channel axis innermost so the noise block stays resident across it.
            grid=(N, n_s, n_c),
            in_specs=[
                pl.BlockSpec((1, tc, thw), lambda n, s, c, scale: (n, c, s)),  # x
                pl.BlockSpec((1, 1, thw), lambda n, s, c, scale: (n, 0, s)),   # noise
            ],
            out_specs=pl.BlockSpec((1, tc, thw), lambda n, s, c, scale: (n, c, s)),
        ),
        compiler_params=pltpu.CompilerParams(
            dimension_semantics=("parallel", "parallel", "parallel"),
            vmem_limit_bytes=vmem_limit),
    )(scale, x2, noise2)

    return out.reshape(N, C, H, W)


def reference_pixelwise_randomized_noise(x, noise, noise_scaler):
    """Pure-JAX reference mirroring the PyTorch forward."""
    return x + noise * noise_scaler


if __name__ == "__main__":
    # Small shapes consistent with the module: batch=2, channels=4, spatial=16.
    N, C, H, W = 2, 4, 16, 16

    key = jax.random.PRNGKey(0)
    k_x, k_n = jax.random.split(key)
    x = jax.random.normal(k_x, (N, C, H, W), dtype=jnp.float32)
    # The module draws noise_inputs = x.new_empty(N,1,H,W).normal_(); here the
    # draw happens in the wrapper (deterministic key) and is fed to the kernel.
    noise = jax.random.normal(k_n, (N, 1, H, W), dtype=jnp.float32)
    noise_scaler = jnp.float32(0.37)   # learned scalar (initialized to 0 in PyTorch)

    out = pixelwise_randomized_noise(x, noise, noise_scaler)
    out = jax.block_until_ready(out)

    ref = reference_pixelwise_randomized_noise(x, noise, noise_scaler)
    ref = jax.block_until_ready(ref)

    assert out.shape == (N, C, H, W)
    np.testing.assert_allclose(np.asarray(out), np.asarray(ref),
                               rtol=1e-6, atol=1e-6)

    # Also exercise the module's initial state (noise_scaler == 0 -> identity).
    out0 = pixelwise_randomized_noise(x, noise, jnp.float32(0.0))
    out0 = jax.block_until_ready(out0)
    np.testing.assert_allclose(np.asarray(out0), np.asarray(x), rtol=0, atol=0)

    print("KERNEL_OK")
</pallas_src>

<mosaic_0001>
module attributes {stable_mosaic.version = 11 : i64} {
  func.func @_noise_kernel(%arg0: i32, %arg1: i32, %arg2: i32, %arg3: memref<1xf32, #tpu.memory_space<smem>>, %arg4: memref<1x4x256xf32, #tpu.memory_space<vmem>>, %arg5: memref<1x1x256xf32, #tpu.memory_space<vmem>>, %arg6: memref<1x4x256xf32, #tpu.memory_space<vmem>>) attributes {dimension_semantics = [#tpu.dimension_semantics<parallel>, #tpu.dimension_semantics<parallel>, #tpu.dimension_semantics<parallel>], iteration_bounds = array<i64: 2, 1, 1>, scalar_prefetch = 1 : i64, scratch_operands = 0 : i64, tpu.core_type = #tpu.core_type<tc>, window_params = [{transform_indices = @transform_0, window_bounds = array<i64: 1, 4, 256>}, {transform_indices = @transform_1, window_bounds = array<i64: 1, 1, 256>}, {transform_indices = @transform_2, window_bounds = array<i64: 1, 4, 256>}]} {
    %c0 = arith.constant 0 : index
    %0 = memref.load %arg3[%c0] : memref<1xf32, #tpu.memory_space<smem>>
    %c0_0 = arith.constant 0 : index
    %c0_1 = arith.constant 0 : index
    %c0_2 = arith.constant 0 : index
    %1 = vector.load %arg5[%c0_0, %c0_1, %c0_2] : memref<1x1x256xf32, #tpu.memory_space<vmem>>, vector<1x1x256xf32>
    %2 = vector.broadcast %0 : f32 to vector<1x1x256xf32>
    %3 = arith.mulf %1, %2 : vector<1x1x256xf32>
    %c0_3 = arith.constant 0 : index
    %c0_4 = arith.constant 0 : index
    %c0_5 = arith.constant 0 : index
    %4 = vector.load %arg4[%c0_3, %c0_4, %c0_5] : memref<1x4x256xf32, #tpu.memory_space<vmem>>, vector<1x4x256xf32>
    %5 = vector.broadcast %3 : vector<1x1x256xf32> to vector<1x4x256xf32>
    %6 = arith.addf %4, %5 : vector<1x4x256xf32>
    %c0_6 = arith.constant 0 : index
    %c0_7 = arith.constant 0 : index
    %c0_8 = arith.constant 0 : index
    %7 = vector.load %arg6[%c0_6, %c0_7, %c0_8] : memref<1x4x256xf32, #tpu.memory_space<vmem>>, vector<1x4x256xf32>
    tpu.vector_store %arg6[%c0_6, %c0_7, %c0_8], %6 {strides = array<i32>} : memref<1x4x256xf32, #tpu.memory_space<vmem>>, vector<1x4x256xf32>,
    return
  }
  func.func @transform_0(%arg0: i32, %arg1: i32, %arg2: i32, %arg3: memref<1xf32, #tpu.memory_space<smem>>) -> (i32, i32, i32) {
    %c0_i32 = arith.constant 0 : i32
    return %arg0, %arg2, %arg1 : i32, i32, i32
  }
  func.func @transform_1(%arg0: i32, %arg1: i32, %arg2: i32, %arg3: memref<1xf32, #tpu.memory_space<smem>>) -> (i32, i32, i32) {
    %c0_i32 = arith.constant 0 : i32
    %c0_i32_0 = arith.constant 0 : i32
    return %arg0, %c0_i32, %arg1 : i32, i32, i32
  }
  func.func @transform_2(%arg0: i32, %arg1: i32, %arg2: i32, %arg3: memref<1xf32, #tpu.memory_space<smem>>) -> (i32, i32, i32) {
    %c0_i32 = arith.constant 0 : i32
    return %arg0, %arg2, %arg1 : i32, i32, i32
  }
}

</mosaic_0001>

<bundles_post_ra>
// kernel: tpu_custom_call.1
= control target key start
LH: loop header
LB: loop body
LE: loop exit
PB: predicated region body
PF: predicated region fallthrough
CT: control target
= control target key end

     0   :  { %s767_s0 = inlined_call_operand.<no memory space> [shape: f32[1], index: 0, kind: input, shape index: {}]   ;;  %s768_s1 = inlined_call_operand.hbm [shape: f32[2,4,256], index: 1, kind: input, shape index: {}]   ;;  %s769_s2 = inlined_call_operand.vmem [shape: f32[2,1,256], index: 2, kind: input, shape index: {}]   ;;  %s770_s3 = inlined_call_operand.hbm [shape: f32[2,4,256], index: 3, kind: output, shape index: {}]  }
   0x1   :  { %8 = sst [smem:[#allocation3]] %s767_s0 }
   0x2   :  { %9 = vsyncpa [#allocation5], 0 }
   0x3   :  { %11 = vsyncpa [#allocation5 + $0x1], 0 }
   0x4   :  { %12 = vsyncpa [#allocation6], 0 }
   0x5   :  { %14 = vsyncpa [#allocation6 + $0x1], 0  ;;  %s590_s14 = smov 0   ;;  %s592_s15 = smov 0  }
   0x6   :  { %s594_s16 = smov 0   ;;  %s596_s17 = smov 0  }
   0x7   :  { %s598_s18 = smov 0   ;;  %s600_s19 = smov 0  }
   0x8 LB: > { %s371_s0 = sadd.s32 4294967295, %s563_s19   ;;  %s372_s20 = sadd.s32 4294967294, %s563_s19   ;;  %s563_s19 = sphi %s600_s19, %s20_s19   ;;  %s559_s18 = sphi %s598_s18, %s786_s18   ;;  %s555_s17 = sphi %s596_s17, %s785_s17   ;;  %s551_s16 = sphi %s594_s16, %s784_s16   ;;  %s547_s15 = sphi %s592_s15, %s783_s15   ;;  %s543_s14 = sphi %s590_s14, %s782_s14  }
   0x9   : > { %s39_s21 = sadd.s32 1, %s559_s18  ;;  %s50_s22 = sadd.s32 1, %s551_s16 }
   0xa   : > { %p41_p0 = scmp.ge.s32.totalorder %s39_s21, 2  ;;  %p57_p1 = scmp.ne.s32.totalorder %s551_s16, %s547_s15 }
   0xb   : > { %p58_p2 = scmp.eq.s32.totalorder %s563_s19, 0  ;;  %p63_p3 = scmp.ne.s32.totalorder %s547_s15, %s543_s14 }
   0xc   : > { %s788_s21 = smov (%p41_p0, %s39_s21), 0  ;;  %p64_p5 = scmp.eq.s32.totalorder %s371_s0, 0 }
   0xd   : > { %p631_p4 = por %p58_p2, %p57_p1  ;;  %s43_s24 = ssub.s32 %s559_s18, %s788_s21 }
   0xe   : > { %p119_p6 = scmp.eq.s32.totalorder %s371_s0, 1  ;;  %p48_p7 = scmp.eq.s32.totalorder %s43_s24, 0 }
   0xf   : > { %p637_p8 = por %p64_p5, %p63_p3  ;;  %p125_p10 = scmp.eq.s32.totalorder %s372_s20, 1 }
  0x10   : > { %p641_p9 = por %p119_p6, %p57_p1  ;;  %p401_p13 = scmp.lt.s32.totalorder %s563_s19, 2 }
  0x11   : > { %s646_s27 = scalar_select %p48_p7, %s551_s16, %s50_s22  }
  0x12   : > { %s774_s26 = scalar_select %p641_p9, 1, 0 }
  0x13   : > { %p648_p11 = por %p125_p10, %p63_p3  ;;  %s145_s29 = sand.u32 1, %s551_s16  }
  0x14   : > { %s375_s30 = sshll.u32 %s145_s29, 3  ;;  %s387_s4 = sshll.u32 %s559_s18, 7 }
  0x15   : > { %s775_s28 = scalar_select %p648_p11, 1, 0 }
  0x16   : > { %s659_s7 = scalar_lea.hbm %s768_s1, %s387_s4  ;;  %s149_s8 = scalar_lea.vmem [#allocation4], %s375_s30 }
  0x17   : > { %s161_s9 = sshll.u32 %s149_s8, 4  ;;  %p665_p0 = pnand %p401_p13, %p631_p4  ;;  %s661_s9 = int_to_ptr.vmem [resolvable:$true] %s161_s9 }
  0x18   : > { %s146_s11 = scalar_lea.sflag [#allocation5], %s145_s29  ;;  %s451_s12 = scalar_lea.hbm %s659_s7, 128 }
  0x19   : > { %p452_p3 = scmp.ne.s32.totalorder %s659_s7, %s451_s12  ;;  %p453_p5 = pneg %p665_p0 }
  0x1a   : > { %s456_s20 = scalar_lea.hbm %s768_s1, 256  ;;  %p457_p4 = scmp.lt.u32.totalorder %s659_s7, %s768_s1 }
  0x1b   : > { %p454_p6 = pnand %p453_p5, %p452_p3  ;;  %p458_p10 = scmp.lt.u32.totalorder %s456_s20, %s451_s12 }
  0x1c   : > { %p460_p12 = scmp.lt.u32.totalorder %s451_s12, %s659_s7 }
  0x1d   : > { %p455_p7 = pneg %p454_p6  ;;  %p459_p13 = por %p458_p10, %p457_p4 }
  0x1f   : > { %p461_p1 = por %p460_p12, %p459_p13 }
  0x21   : > { %p462_p2 = pnand %p461_p1, %p455_p7 }
  0x23   : > { %465 = shalt.err (!%p462_p2)
}
  0x24   : > { %s466_s24 = scalar_lea.vmem %s661_s9, 128  ;;  %s565_s29 = smov [#allocation4]  }
  0x25   : > { %p467_p3 = scmp.ne.s32.totalorder %s661_s9, %s466_s24  ;;  %s471_s30 = sshll.u32 %s565_s29, 4  ;;  %s472_s30 = int_to_ptr.vmem [resolvable:$false] %s471_s30 }
  0x26   : > { %s473_s4 = scalar_lea.vmem %s472_s30, 256  ;;  %p474_p9 = scmp.lt.s32.totalorder %s661_s9, %s472_s30 }
  0x27   : > { %p469_p6 = pnand %p467_p3, %p453_p5  ;;  %p475_p4 = scmp.lt.s32.totalorder %s473_s4, %s466_s24 }
  0x29   : > { %p470_p11 = pneg %p469_p6  ;;  %p476_p10 = por %p475_p4, %p474_p9 }
  0x2b   : > { %p477_p12 = pnand %p476_p10, %p470_p11 }
  0x2d   : > { %480 = shalt.err (!%p477_p12)
}
  0x2e   : > { %396 = dma.hbm_to_vmem [thread:$0]  (!%p665_p0), %s659_s7, 128, %s661_s9, %s146_s11  }
  0x2f   : > { %p777_p1 = scmp.lt.s32.totalorder %s563_s19, 3  ;;  %p778_p2 = scmp.ge.s32.totalorder %s563_s19, 1 }
  0x31   : > { %p179_p5 = pnand %p778_p2, %p777_p1 }
  0x32   : > { %s701_s5 = sand.u32 (!%p179_p5), 1, %s547_s15  }
  0x33   : > { %182 = sbr.rel (%p179_p5) target bundleno = 88 (0x58), region = 28  ;;  %s379_s6 = sshll.u32 (!%p179_p5), %s701_s5, 3 }
  0x34   : > { %s185_s8 = scalar_lea.sflag (!%p179_p5), [#allocation5], %s701_s5  ;;  %s188_s12 = scalar_lea.vmem (!%p179_p5), [#allocation4], %s379_s6 }
  0x3a   : > { %534 = dma.done.wait (%p637_p8), %s185_s8, 128  }
  0x3b   : > { %536 = vsyncadd (%p637_p8), %s185_s8, 4294967168  ;;  %p219_p9 = scmp.lt.s32.totalorder %s555_s17, 1  ;;  %v234_v0 = vlaneseq  ;;  %s228_s7 = sld [smem:[#allocation3]]  ;;  %v232_v9 = vld [vmem:[%s188_s12] sm:$0xff] }
  0x3c   : > { %s216_s25 = scalar_lea.vmem [#allocation7], %s379_s6  ;;  %s388_s22 = sshll.u32 %s555_s17, 7 }
  0x3d   : > { %s220_s9 = scalar_select %p219_p9, %s555_s17, 1  ;;  %v235_v1 = vshrl.u32 %v234_v0, 7 }
  0x3e   : > { %s265_s20 = sshll.u32 %s216_s25, 4  ;;  %s720_s29 = scalar_lea.hbm %s770_s3, %s388_s22  ;;  %s715_s20 = int_to_ptr.vmem [resolvable:$true] %s265_s20 }
  0x3f   : > { %s381_s10 = sshll.u32 %s220_s9, 1  ;;  %v236_v2 = vsub.s32 0, %v235_v1  ;;  %v240_v3 = vsub.s32 1, %v235_v1  ;;  %s247_s30 = scalar_lea.sflag [#allocation6], %s701_s5 }
  0x40   : > { %s225_s0 = scalar_lea.vmem %s769_s2, %s381_s10  ;;  %s481_s4 = scalar_lea.vmem %s715_s20, 128 }
  0x41   : > { %v229_v4 = vld [vmem:[%s225_s0] sm:$0x3]  ;;  %v230_v5 = vstv %s228_s7  ;;  %p482_p8 = scmp.ne.s32.totalorder %s715_s20, %s481_s4  ;;  %p779_p11 = scmp.ne.s32.totalorder %s774_s26, 0 }
  0x42   : > { %v231_v6 = vmul.f32 %v230_v5, %v229_v4  ;;  %s566_s17 = smov [#allocation7]  }
  0x43   : > { %p483_p0 = pnand %p482_p8, %p779_p11  ;;  %s485_s6 = sshll.u32 %s566_s17, 4  ;;  %s486_s6 = int_to_ptr.vmem [resolvable:$false] %s485_s6 }
  0x44   : > { %v237_v7 = vrot.slane %v231_v6, %v236_v2  ;;  %v241_v8 = vrot.slane %v231_v6, %v240_v3  ;;  %s487_s8 = scalar_lea.vmem %s486_s6, 256  ;;  %p488_p13 = scmp.lt.s32.totalorder %s715_s20, %s486_s6 }
  0x45   : > { %p484_p7 = pneg %p483_p0  ;;  %p489_p3 = scmp.lt.s32.totalorder %s487_s8, %s481_s4 }
  0x46   : > { %v242_v10 = vcombine.low %v237_v7, %v241_v8 }
  0x47   : > { %p490_p6 = por %p489_p3, %p488_p13 }
  0x48   : > { %v244_v11 = vadd.f32 %v242_v10, %v232_v9 }
  0x49   : > { %p491_p4 = pnand %p490_p6, %p484_p7 }
  0x4a   : > { %245 = vst [vmem:[%s216_s25] sm:$0xff] %v244_v11 }
  0x4b   : > { %494 = shalt.err (!%p491_p4)
}
  0x4c   : > { %s495_s5 = scalar_lea.hbm %s720_s29, 128  ;;  %s499_s9 = scalar_lea.hbm %s770_s3, 256 }
  0x4d   : > { %p496_p10 = scmp.ne.s32.totalorder %s720_s29, %s495_s5  ;;  %p500_p2 = scmp.lt.u32.totalorder %s720_s29, %s770_s3 }
  0x4e   : > { %p501_p5 = scmp.lt.u32.totalorder %s499_s9, %s495_s5  ;;  %p503_p8 = scmp.lt.u32.totalorder %s495_s5, %s720_s29 }
  0x4f   : > { %p497_p12 = pnand %p496_p10, %p779_p11 }
  0x50   : > { %p502_p9 = por %p501_p5, %p500_p2 }
  0x51   : > { %p498_p1 = pneg %p497_p12 }
  0x52   : > { %p504_p0 = por %p503_p8, %p502_p9 }
  0x54   : > { %p505_p7 = pnand %p504_p0, %p498_p1 }
  0x56   : > { %508 = shalt.err (!%p505_p7)
}
  0x57   : > { %391 = dma.vmem_to_hbm [thread:$0]  (%p779_p11), %s715_s20, 128, %s720_s29, %s247_s30  }
  0x58 PF: > { %s277_s13 = sand.u32 1, %s543_s14   ;;  %p780_p13 = scmp.ne.s32.totalorder %s775_s28, 0 }
  0x59   : > { %p781_p3 = scmp.ge.s32.totalorder %s563_s19, 2  ;;  %s278_s0 = scalar_lea.sflag [#allocation6], %s277_s13 }
  0x5b   : > { %p398_p6 = pnand %p781_p3, %p780_p13 }
  0x5d   : > { %538 = dma.done.wait (!%p398_p6), %s278_s0, 128  }
  0x5e   : > { %540 = vsyncadd (!%p398_p6), %s278_s0, 4294967168  ;;  %s20_s19 = sadd.s32 1, %s563_s19   ;;  %s782_s14 = smov %s547_s15 }
  0x5f   : > { %p17_p4 = scmp.ge.s32.totalorder %s20_s19, 4   ;;  %s783_s15 = smov %s551_s16 }
  0x60   : > { %s784_s16 = smov %s646_s27  ;;  %s785_s17 = smov %s559_s18 }
  0x61   : > { %s786_s18 = smov %s788_s21  ;;  %19 = sbr.rel (!%p17_p4) target bundleno = 8 (0x8), region = 76 }
  0x68   :  { %283 = vsyncpa [#allocation5], 1 }
  0x69   :  { %285 = vsyncpa [#allocation5 + $0x1], 1 }
  0x6a   :  { %286 = vsyncpa [#allocation6], 1 }
  0x6b   :  { %288 = vsyncpa [#allocation6 + $0x1], 1 }

</bundles_post_ra>
